<compile_context>
chip_gen: v7x
topology: tpu7x:2x2x1
jax: 0.10.0
libtpu: 0.0.40
codegen_flags: <defaults>
</compile_context>

<pallas_src>
import jax
import jax.numpy as jnp
from jax.experimental import pallas as pl
from jax.experimental.pallas import tpu as pltpu

embedding_dim = 3
num_tokens = 30


def _embedding_gather_kernel(ids_ref, table_ref, out_ref):
    # ids_ref:   (TB, 1) int32  — this grid step's token ids.
    # table_ref: (V, D)  f32    — full embedding table, VMEM-resident.
    # out_ref:   (TB, D) f32    — gathered rows for this token block.
    tb = ids_ref.shape[0]
    v = table_ref.shape[0]

    ids = jnp.clip(ids_ref[...], 0, v - 1)                      # (TB, 1) int32
    iota_v = jax.lax.broadcasted_iota(jnp.int32, (tb, v), 1)     # (TB, V)
    onehot = (ids == iota_v).astype(table_ref.dtype)             # (TB, V) f32
    out_ref[...] = jnp.dot(
        onehot, table_ref[...], preferred_element_type=jnp.float32
    ).astype(out_ref.dtype)


def learnable_tokens_forward(input_tokens, embedding_table, *, token_block=256):
    """input_tokens: int array of any shape; embedding_table: (V, D) f32."""
    orig_shape = input_tokens.shape
    v, d = embedding_table.shape

    ids_flat = input_tokens.reshape(-1).astype(jnp.int32)
    n = ids_flat.shape[0]

    # Token block: multiple of 8 (sublane aligned); large enough to amortize
    # per-step overhead, but no bigger than needed at tiny N.
    if n >= token_block:
        tb = token_block
    else:
        tb = max(8, ((n + 7) // 8) * 8)
    n_pad = ((n + tb - 1) // tb) * tb
    num_blocks = n_pad // tb

    # Pad ids (padded entries gather row 0 and are sliced off afterwards).
    ids_padded = jnp.pad(ids_flat, (0, n_pad - n)).reshape(n_pad, 1)

    cost = pl.CostEstimate(
        flops=2 * n_pad * v * d,          # one-hot @ table per block
        transcendentals=0,
        bytes_accessed=n_pad * 4 + v * d * 4 + n_pad * d * 4,
    )

    out_flat = pl.pallas_call(
        _embedding_gather_kernel,
        out_shape=jax.ShapeDtypeStruct((n_pad, d), embedding_table.dtype),
        grid_spec=pltpu.PrefetchScalarGridSpec(
            num_scalar_prefetch=0,
            grid=(num_blocks,),
            in_specs=[
                # TB token ids per step.
                pl.BlockSpec((tb, 1), lambda i: (i, 0)),
                # Whole table, same block every step -> DMA'd once, resident.
                pl.BlockSpec((v, d), lambda i: (0, 0)),
            ],
            out_specs=pl.BlockSpec((tb, d), lambda i: (i, 0)),
        ),
        compiler_params=pltpu.CompilerParams(
            dimension_semantics=("parallel",),
        ),
        cost_estimate=cost,
    )(ids_padded, embedding_table)

    return out_flat[:n].reshape(*orig_shape, d)


if __name__ == "__main__":
    key = jax.random.PRNGKey(0)
    k_emb, k_tok = jax.random.split(key)

    # nn.Embedding(num_tokens, embedding_dim) initializes weights ~ N(0, 1).
    embedding_table = jax.random.normal(
        k_emb, (num_tokens, embedding_dim), dtype=jnp.float32
    )

    # Example inputs: batch=2, seq=8 token ids in [0, num_tokens).
    input_tokens = jax.random.randint(
        k_tok, (2, 8), minval=0, maxval=num_tokens, dtype=jnp.int32
    )

    out = learnable_tokens_forward(input_tokens, embedding_table)
    out = jax.block_until_ready(out)

    # Sanity check against a plain-JAX gather.
    ref = embedding_table[input_tokens]
    assert out.shape == (2, 8, embedding_dim), out.shape
    assert jnp.allclose(out, ref, atol=1e-6), "mismatch vs reference gather"

    print("KERNEL_OK")
</pallas_src>

<mosaic_0001>
module attributes {stable_mosaic.version = 11 : i64} {
  func.func @_embedding_gather_kernel(%arg0: i32, %arg1: memref<16x1xi32, #tpu.memory_space<vmem>>, %arg2: memref<30x3xf32, #tpu.memory_space<vmem>>, %arg3: memref<16x3xf32, #tpu.memory_space<vmem>>) attributes {dimension_semantics = [#tpu.dimension_semantics<parallel>], iteration_bounds = array<i64: 1>, scalar_prefetch = 0 : i64, scratch_operands = 0 : i64, tpu.core_type = #tpu.core_type<tc>, window_params = [{transform_indices = @transform_0, window_bounds = array<i64: 16, 1>}, {pipeline_mode = #tpu.pipeline_mode<synchronous>, transform_indices = @transform_1, window_bounds = array<i64: 30, 3>}, {transform_indices = @transform_2, window_bounds = array<i64: 16, 3>}]} {
    %c0 = arith.constant 0 : index
    %c0_0 = arith.constant 0 : index
    %0 = vector.load %arg1[%c0, %c0_0] : memref<16x1xi32, #tpu.memory_space<vmem>>, vector<16x1xi32>
    %c0_i32 = arith.constant 0 : i32
    %c29_i32 = arith.constant 29 : i32
    %1 = vector.broadcast %c0_i32 : i32 to vector<16x1xi32>
    %2 = arith.maxsi %1, %0 : vector<16x1xi32>
    %3 = vector.broadcast %c29_i32 : i32 to vector<16x1xi32>
    %4 = arith.minsi %3, %2 : vector<16x1xi32>
    %5 = tpu.iota {dimensions = array<i32: 1>} : vector<16x30xi32>
    %6 = vector.broadcast %4 : vector<16x1xi32> to vector<16x30xi32>
    %7 = arith.cmpi eq, %6, %5 : vector<16x30xi32>
    %8 = arith.extui %7 : vector<16x30xi1> to vector<16x30xi32>
    %9 = arith.sitofp %8 : vector<16x30xi32> to vector<16x30xf32>
    %c0_1 = arith.constant 0 : index
    %c0_2 = arith.constant 0 : index
    %10 = vector.load %arg2[%c0_1, %c0_2] : memref<30x3xf32, #tpu.memory_space<vmem>>, vector<30x3xf32>
    %cst = arith.constant dense<0.000000e+00> : vector<16x3xf32>
    %11 = tpu.matmul %9, %10, %cst {dimension_numbers = #tpu.dot_dimension_numbers<[1], [0], [0], [1], [0, 0, 1, 1], [], []>} : vector<16x30xf32>, vector<30x3xf32>, vector<16x3xf32> -> vector<16x3xf32>
    %c0_3 = arith.constant 0 : index
    %c0_4 = arith.constant 0 : index
    %12 = vector.load %arg3[%c0_3, %c0_4] : memref<16x3xf32, #tpu.memory_space<vmem>>, vector<16x3xf32>
    tpu.vector_store %arg3[%c0_3, %c0_4], %11 {strides = array<i32>} : memref<16x3xf32, #tpu.memory_space<vmem>>, vector<16x3xf32>,
    return
  }
  func.func @transform_0(%arg0: i32) -> (i32, i32) {
    %c0_i32 = arith.constant 0 : i32
    %c0_i32_0 = arith.constant 0 : i32
    return %arg0, %c0_i32 : i32, i32
  }
  func.func @transform_1(%arg0: i32) -> (i32, i32) {
    %c0_i32 = arith.constant 0 : i32
    %c0_i32_0 = arith.constant 0 : i32
    %c0_i32_1 = arith.constant 0 : i32
    return %c0_i32, %c0_i32_0 : i32, i32
  }
  func.func @transform_2(%arg0: i32) -> (i32, i32) {
    %c0_i32 = arith.constant 0 : i32
    %c0_i32_0 = arith.constant 0 : i32
    return %arg0, %c0_i32 : i32, i32
  }
}

</mosaic_0001>

<bundles_post_ra>
// kernel: tpu_custom_call.1
= control target key start
LH: loop header
LB: loop body
LE: loop exit
PB: predicated region body
PF: predicated region fallthrough
CT: control target
= control target key end

     0   :  { %v168_v0 = vmov 0   ;;  %vm46_vm4 = vcmask 1045504   ;;  %vm169_vm5 = vmmov 1   ;;  %v21_v13 = vlaneseq  ;;  %s210_s0 = inlined_call_operand.vmem [shape: s32[16,1], index: 0, kind: input, shape index: {}]   ;;  %s211_s1 = inlined_call_operand.vmem [shape: f32[30,3], index: 1, kind: input, shape index: {}]   ;;  %s212_s2 = inlined_call_operand.vmem [shape: f32[16,3], index: 2, kind: output, shape index: {}]  }
   0x1   :  { %167 = vset.pattern.permute.xlu0 %v168_v0  ;;  %v11_v1 = vld [vmem:[%s210_s0] sm:$0xff]  ;;  %v12_v2 = vld [vmem:[%s210_s0 + $0x8] sm:$0xff]  ;;  %v37_v9 = vld [vmem:[%s211_s1 + $0x10] sm:$0xff]  ;;  %vm39_vm7 = vcmask 244736   ;;  %v170_v16 = vmov 0.0   ;;  %vm125_vm10 = vcmask 23552  }
   0x2   :  { %v35_v3 = vld [vmem:[%s211_s1] sm:$0xff]  ;;  %vm13_vm0 = vcmp.gt.s32.totalorder %v11_v1, 0  ;;  %vm15_vm1 = vcmp.gt.s32.totalorder %v12_v2, 0  ;;  %v36_v4 = vld [vmem:[%s211_s1 + $0x8] sm:$0xff]  ;;  %v38_v10 = vld [vmem:[%s211_s1 + $0x18] sm:$0x3f] }
   0x3   :  { %v14_v5 = vsel %vm13_vm0, %v11_v1, 0  ;;  %v16_v6 = vsel %vm15_vm1, %v12_v2, 0  ;;  %v154_v7 = vpack.c.bf16 %v36_v4, %v35_v3  ;;  %v158_v11 = vpack.c.bf16 %v38_v10, %v37_v9  ;;  %vm159_vm6 = vmpackc.low %vm46_vm4, %vm169_vm5 }
   0x4   :  { %vm17_vm2 = vcmp.lt.s32.totalorder %v14_v5, 29  ;;  %vm19_vm3 = vcmp.lt.s32.totalorder %v16_v6, 29  ;;  %v22_v14 = vand.u32 127, %v21_v13 }
   0x5   :  { %v18_v8 = vsel %vm17_vm2, %v14_v5, 29  ;;  %155 = vmatprep.subr.bf16.mxu0 %v154_v7  ;;  %v20_v12 = vsel %vm19_vm3, %v16_v6, 29 }
   0x6   :  { %24 = vperm.xlu0 %167, %v18_v8   ;;  %157 = vmatpush3.bf16.msra.mxu0 %v154_v7 }
   0x7   :  { %160 = vmatprep.subr.msk.bf16.mxu0 %vm159_vm6, %v158_v11 }
   0xa   :  { %27 = vperm.xlu0 %167, %v20_v12   ;;  %163 = vmatpush3.bf16.msk.msra.mxu0 %vm159_vm6, %v158_v11 }
  0x85   :  { %v25_v15 = vpop.permute.xlu0 %24 }
  0x86   :  { %vm29_vm8 = vcmp.eq.s32.totalorder %v25_v15, %v22_v14 }
  0x87   :  { %v132_v17 = vsel %vm29_vm8, 1.0, %v170_v16 }
  0x88   :  { %151 = vmatprep.mubr.msk.f32.mxu0 %vm39_vm7, %v132_v17 }
  0x89   :  { %v28_v18 = vpop.permute.xlu0 %27 }
  0x8a   :  { %vm30_vm9 = vcmp.eq.s32.totalorder %v28_v18, %v22_v14 }
  0x8b   :  { %v133_v19 = vsel %vm30_vm9, 1.0, %v170_v16 }
  0x8c   :  { %152 = vmatmul.mubr.msk.f32.vlgmr.msra.gmra.mrb[0].mxu0 %vm39_vm7, %v133_v19 }
 0x15f   :  { %v153_v20 = vpop.f32.mrb[0].mxu0 }
 0x160   :  { %127 = vst.msk [vmem:[%s212_s2 + $0x8] sm:$0xff] %vm125_vm10, %v153_v20  ;;  %v116_v21 = vpop.f32.mrb[1].mxu0 }
 0x161   :  { %126 = vst.msk [vmem:[%s212_s2] sm:$0xff] %vm125_vm10, %v116_v21 }

</bundles_post_ra>
